<compile_context>
chip_gen: v5e
topology: v5e:2x2
jax: 0.10.0
libtpu: 0.0.40
codegen_flags: <defaults>
</compile_context>

<pallas_src>
import jax
import jax.numpy as jnp
from jax.experimental import pallas as pl
from jax.experimental.pallas import tpu as pltpu


def _mlp_kernel(x_ref, w1_ref, b1_ref, w3_ref, b3_ref, o_ref):
    # ---- linear1: cast to bf16 in-kernel, f32 accumulation on the MXU ----
    x = x_ref[...].astype(jnp.bfloat16)
    h = jnp.dot(x, w1_ref[...].astype(jnp.bfloat16),
                preferred_element_type=jnp.float32)
    # bias + ReLU in f32 on the VPU (bias broadcasts over batch rows)
    h = jnp.maximum(h + b1_ref[...], 0.0)

    # dropout: identity at inference (see TODO at top of file)

    # ---- linear3: hidden back to bf16 for the second MXU pass ----
    out = jnp.dot(h.astype(jnp.bfloat16), w3_ref[...].astype(jnp.bfloat16),
                  preferred_element_type=jnp.float32)
    o_ref[...] = (out + b3_ref[...]).astype(o_ref.dtype)


def mlp_forward(x, w1, b1, w3, b3, *, tile_m=8192, small_batch=512,
                out_dtype=jnp.float32):
    """x: (B, D_in), w1: (D_in, H), b1: (H,) or (1, H), w3: (H, C), b3: (C,) or (1, C).

    Returns (B, C) logits in `out_dtype` (f32 by default to match the PyTorch
    module; pass out_dtype=jnp.bfloat16 to halve output HBM writeback if the
    consumer tolerates it).
    """
    B, D = x.shape
    H = w1.shape[1]
    C = w3.shape[1]

    x = x.astype(jnp.float32)
    w1 = w1.astype(jnp.float32)
    w3 = w3.astype(jnp.float32)
    b1f = b1.astype(jnp.float32).reshape(1, H)
    b3f = b3.astype(jnp.float32).reshape(1, C)

    out_bytes = jnp.dtype(out_dtype).itemsize

    def _cost(rows):
        flops = 2 * rows * (D * H + H * C)
        bytes_accessed = (rows * D * 4                     # x (f32, read once)
                          + D * H * 4 + H * C * 4          # weights (f32)
                          + H * 4 + C * 4                  # biases (f32)
                          + rows * C * out_bytes)          # unpadded output
        return pl.CostEstimate(flops=int(flops), transcendentals=0,
                               bytes_accessed=int(bytes_accessed))

    if B <= small_batch:
        # Small batch: single block, whole problem resident in VMEM.
        # No grid -> no pipeline-step overhead, no double-buffering, and no
        # padding/slicing anywhere in the wrapper.
        return pl.pallas_call(
            _mlp_kernel,
            out_shape=jax.ShapeDtypeStruct((B, C), out_dtype),
            in_specs=[pl.BlockSpec(memory_space=pltpu.MemorySpace.VMEM)] * 5,
            out_specs=pl.BlockSpec(memory_space=pltpu.MemorySpace.VMEM),
            cost_estimate=_cost(B),
        )(x, w1, b1f, w3, b3f)

    # ---- batch-tiled path ----
    # At least 2 blocks so v7x's two TensorCores both get work; tile rows are
    # a multiple of 8 (sublane).  The trailing block may be partial: its OOB
    # reads are garbage but its OOB writes are discarded by Pallas, so no
    # explicit padding of x or the output is needed.
    half = -(-B // 2)                       # ceil(B / 2)
    TM = min(tile_m, ((half + 7) // 8) * 8)
    TM = max(TM, 8)
    n_blocks = pl.cdiv(B, TM)

    return pl.pallas_call(
        _mlp_kernel,
        out_shape=jax.ShapeDtypeStruct((B, C), out_dtype),
        grid=(n_blocks,),
        in_specs=[
            pl.BlockSpec((TM, D), lambda i: (i, 0)),   # x: tiled over batch
            pl.BlockSpec((D, H), lambda i: (0, 0)),    # weights/biases resident
            pl.BlockSpec((1, H), lambda i: (0, 0)),
            pl.BlockSpec((H, C), lambda i: (0, 0)),
            pl.BlockSpec((1, C), lambda i: (0, 0)),
        ],
        out_specs=pl.BlockSpec((TM, C), lambda i: (i, 0)),
        compiler_params=pltpu.CompilerParams(
            dimension_semantics=("parallel",)),
        cost_estimate=_cost(B),
    )(x, w1, b1f, w3, b3f)


def _jax_reference_bf16(x, w1, b1, w3, b3):
    """Mirrors the kernel's numerics: bf16 MXU operands, f32 accumulation."""
    h = jnp.dot(x.astype(jnp.bfloat16), w1.astype(jnp.bfloat16),
                preferred_element_type=jnp.float32)
    h = jnp.maximum(h + b1.astype(jnp.float32), 0.0)
    out = jnp.dot(h.astype(jnp.bfloat16), w3.astype(jnp.bfloat16),
                  preferred_element_type=jnp.float32)
    return out + b3.astype(jnp.float32)


if __name__ == "__main__":
    # Shapes consistent with MLP(n_hidden=32, input_shape=16, n_classes=8,
    # dropout=0.1, num_layers=2)
    batch, input_shape, n_hidden, n_classes = 8, 16, 32, 8

    key = jax.random.PRNGKey(0)
    kx, k1, k2, k3, k4, kx2 = jax.random.split(key, 6)

    x = jax.random.normal(kx, (batch, input_shape), dtype=jnp.float32)

    # Deterministic parameter init (PyTorch-like uniform fan_in scaling).
    bound1 = 1.0 / (input_shape ** 0.5)
    w1 = jax.random.uniform(k1, (input_shape, n_hidden), jnp.float32,
                            -bound1, bound1)
    b1 = jax.random.uniform(k2, (1, n_hidden), jnp.float32, -bound1, bound1)

    bound3 = 1.0 / (n_hidden ** 0.5)
    w3 = jax.random.uniform(k3, (n_hidden, n_classes), jnp.float32,
                            -bound3, bound3)
    b3 = jax.random.uniform(k4, (1, n_classes), jnp.float32, -bound3, bound3)

    # ---- small batch: single-block (no-grid) path ----
    out = mlp_forward(x, w1, b1, w3, b3)
    jax.block_until_ready(out)
    assert out.shape == (batch, n_classes)
    assert out.dtype == jnp.float32

    ref_bf16 = _jax_reference_bf16(x, w1, b1, w3, b3)
    ref_f32 = jnp.maximum(x @ w1 + b1, 0.0) @ w3 + b3
    assert jnp.allclose(out, ref_bf16, atol=1e-3, rtol=1e-3)
    assert jnp.allclose(out, ref_f32, atol=5e-2, rtol=5e-2)

    # ---- larger batch: exercise the batch-tiled (megacore-parallel) path,
    #      including a partial trailing block (1000 is not a multiple of 8*k).
    big_batch = 1000
    xb_big = jax.random.normal(kx2, (big_batch, input_shape), dtype=jnp.float32)
    out_big = mlp_forward(xb_big, w1, b1, w3, b3)
    jax.block_until_ready(out_big)
    assert out_big.shape == (big_batch, n_classes)

    ref_big_bf16 = _jax_reference_bf16(xb_big, w1, b1, w3, b3)
    ref_big_f32 = jnp.maximum(xb_big @ w1 + b1, 0.0) @ w3 + b3
    assert jnp.allclose(out_big, ref_big_bf16, atol=1e-3, rtol=1e-3)
    assert jnp.allclose(out_big, ref_big_f32, atol=5e-2, rtol=5e-2)

    print("KERNEL_OK")
</pallas_src>

<mosaic_0001>
module attributes {stable_mosaic.version = 11 : i64} {
  func.func @_mlp_kernel(%arg0: memref<8x16xf32, #tpu.memory_space<vmem>>, %arg1: memref<16x32xf32, #tpu.memory_space<vmem>>, %arg2: memref<1x32xf32, #tpu.memory_space<vmem>>, %arg3: memref<32x8xf32, #tpu.memory_space<vmem>>, %arg4: memref<1x8xf32, #tpu.memory_space<vmem>>, %arg5: memref<8x8xf32, #tpu.memory_space<vmem>>) attributes {dimension_semantics = [], scalar_prefetch = 0 : i64, scratch_operands = 0 : i64, tpu.core_type = #tpu.core_type<tc>} {
    %c0 = arith.constant 0 : index
    %c0_0 = arith.constant 0 : index
    %0 = vector.load %arg0[%c0, %c0_0] : memref<8x16xf32, #tpu.memory_space<vmem>>, vector<8x16xf32>
    %1 = arith.truncf %0 : vector<8x16xf32> to vector<8x16xbf16>
    %c0_1 = arith.constant 0 : index
    %c0_2 = arith.constant 0 : index
    %2 = vector.load %arg1[%c0_1, %c0_2] : memref<16x32xf32, #tpu.memory_space<vmem>>, vector<16x32xf32>
    %3 = arith.truncf %2 : vector<16x32xf32> to vector<16x32xbf16>
    %cst = arith.constant dense<0.000000e+00> : vector<8x32xf32>
    %4 = tpu.matmul %1, %3, %cst {dimension_numbers = #tpu.dot_dimension_numbers<[1], [0], [0], [1], [0, 0, 1, 1], [], []>} : vector<8x16xbf16>, vector<16x32xbf16>, vector<8x32xf32> -> vector<8x32xf32>
    %c0_3 = arith.constant 0 : index
    %c0_4 = arith.constant 0 : index
    %5 = vector.load %arg2[%c0_3, %c0_4] : memref<1x32xf32, #tpu.memory_space<vmem>>, vector<1x32xf32>
    %6 = vector.broadcast %5 : vector<1x32xf32> to vector<8x32xf32>
    %7 = arith.addf %4, %6 : vector<8x32xf32>
    %cst_5 = arith.constant 0.000000e+00 : f32
    %8 = vector.broadcast %cst_5 : f32 to vector<8x32xf32>
    %9 = arith.maximumf %7, %8 : vector<8x32xf32>
    %10 = arith.truncf %9 : vector<8x32xf32> to vector<8x32xbf16>
    %c0_6 = arith.constant 0 : index
    %c0_7 = arith.constant 0 : index
    %11 = vector.load %arg3[%c0_6, %c0_7] : memref<32x8xf32, #tpu.memory_space<vmem>>, vector<32x8xf32>
    %12 = arith.truncf %11 : vector<32x8xf32> to vector<32x8xbf16>
    %cst_8 = arith.constant dense<0.000000e+00> : vector<8x8xf32>
    %13 = tpu.matmul %10, %12, %cst_8 {dimension_numbers = #tpu.dot_dimension_numbers<[1], [0], [0], [1], [0, 0, 1, 1], [], []>} : vector<8x32xbf16>, vector<32x8xbf16>, vector<8x8xf32> -> vector<8x8xf32>
    %c0_9 = arith.constant 0 : index
    %c0_10 = arith.constant 0 : index
    %14 = vector.load %arg4[%c0_9, %c0_10] : memref<1x8xf32, #tpu.memory_space<vmem>>, vector<1x8xf32>
    %15 = vector.broadcast %14 : vector<1x8xf32> to vector<8x8xf32>
    %16 = arith.addf %13, %15 : vector<8x8xf32>
    %c0_11 = arith.constant 0 : index
    %c0_12 = arith.constant 0 : index
    %17 = vector.load %arg5[%c0_11, %c0_12] : memref<8x8xf32, #tpu.memory_space<vmem>>, vector<8x8xf32>
    tpu.vector_store %arg5[%c0_11, %c0_12], %16 {strides = array<i32>} : memref<8x8xf32, #tpu.memory_space<vmem>>, vector<8x8xf32>,
    return
  }
}

</mosaic_0001>

<bundles_post_ra>
// kernel: tpu_custom_call.1
= control target key start
LH: loop header
LB: loop body
LE: loop exit
PB: predicated region body
PF: predicated region fallthrough
CT: control target
= control target key end

     0   :  { %s187_s0 = inlined_call_operand.vmem [shape: f32[8,16], index: 0, kind: input, shape index: {}]   ;;  %s188_s1 = inlined_call_operand.vmem [shape: f32[16,32], index: 1, kind: input, shape index: {}]   ;;  %s189_s2 = inlined_call_operand.vmem [shape: f32[1,32], index: 2, kind: input, shape index: {}]   ;;  %s190_s3 = inlined_call_operand.vmem [shape: f32[32,8], index: 3, kind: input, shape index: {}]   ;;  %s191_s4 = inlined_call_operand.vmem [shape: f32[1,8], index: 4, kind: input, shape index: {}]   ;;  %s192_s5 = inlined_call_operand.hbm [shape: f32[8,8], index: 5, kind: output, shape index: {}]  }
   0x1   :  { %v24_v0 = vld [vmem:[%s188_s1] sm:$0xff]  ;;  %v25_v1 = vld [vmem:[%s188_s1 + $0x8] sm:$0xff] }
   0x2   :  { %v22_v2 = vld [vmem:[%s187_s0] sm:$0xff]  ;;  %v26_v3 = vpack.c.bf16 %v25_v1, %v24_v0 }
   0x3   :  { %v23_v4 = vpack.c.bf16 %v22_v2, %v22_v2 }
   0x4   :  { %10 = vsyncpa [#allocation3], 0  ;;  %42 = vmatpush.bf16.msra.mxu0 %v26_v3  ;;  %vm31_vm0 = vcmask 130048   ;;  %v52_v5 = vld [vmem:[%s190_s3 + $0x10] sm:$0xff]  ;;  %v53_v6 = vld [vmem:[%s190_s3 + $0x18] sm:$0xff]  ;;  %vm60_vm1 = vcmask 261120  }
   0x5   :  { %v55_v7 = vpack.c.bf16 %v53_v6, %v52_v5  ;;  %v50_v8 = vld [vmem:[%s190_s3] sm:$0xff]  ;;  %v51_v9 = vld [vmem:[%s190_s3 + $0x8] sm:$0xff]  ;;  %s126_s9 = smov [#allocation2]   ;;  %s86_s12 = sshll.u32 %s192_s5, 4  ;;  %vm77_vm2 = vcmask 64512   ;;  %s87_s12 = int_to_ptr.hbm [resolvable:$true] %s86_s12 }
   0x6   :  { %v54_v10 = vpack.c.bf16 %v51_v9, %v50_v8  ;;  %v98_v11 = vld [vmem:[%s189_s2] ss:$0 sm:$0xff]  ;;  %s84_s10 = sshll.u32 %s126_s9, 4  ;;  %s85_s10 = int_to_ptr.vmem [resolvable:$true] %s84_s10 }
   0x7   :  { %95 = vmatmul.msk.bf16.vlgmr.msra.gmra.mxu0 %vm31_vm0, %v23_v4  ;;  %70 = vmatpush.bf16.msra.mxu1 %v55_v7  ;;  %v99_v17 = vld [vmem:[%s191_s4] ss:$0 sm:$0xff] }
   0xb   :  { %71 = vmatpush.bf16.msra.mxu1 %v54_v10 }
  0x84   :  { %v44_v12 = vpop.f32.mrf.mxu0 }
  0x85   :  { %v45_v13 = vadd.f32 %v98_v11, %v44_v12 }
  0x87   :  { %v48_v14 = vmax.f32 %v45_v13, 0.0 }
  0x89   :  { %v49_v15 = vpack.c.bf16 %v48_v14, %v48_v14 }
  0x8b   :  { %96 = vmatmul.msk.bf16.vlgmr.msra.gmra.mxu1 %vm60_vm1, %v49_v15 }
  0x8c   :  { %v46_v16 = vpop.f32.mrf.mxu0 }
 0x108   :  { %v73_v18 = vpop.f32.mrf.mxu1 }
 0x109   :  { %v74_v19 = vadd.f32 %v99_v17, %v73_v18 }
 0x10b   :  { %78 = vst.msk [vmem:[#allocation2] sm:$0xff] %vm77_vm2, %v74_v19 }
 0x10c   :  { %89 = dma.vmem_to_hbm [thread:$0]  %s85_s10, 128, %s87_s12, [#allocation3]  }
 0x110   :  { %v75_v20 = vpop.f32.mrf.mxu1 }
 0x111   :  { %124 = dma.done.wait [#allocation3], 128  }
 0x112   :  { %125 = vsyncadd [#allocation3], 4294967168 }
 0x113   :  { %94 = vsyncpa [#allocation3], 1 }

</bundles_post_ra>
